<compile_context>
chip_gen: v5e
topology: v5e:2x2
jax: 0.10.0
libtpu: 0.0.40
codegen_flags: <defaults>
</compile_context>

<pallas_src>
import jax
import jax.numpy as jnp
from jax.experimental import pallas as pl
from jax.experimental.pallas import tpu as pltpu


def adder_kernel(x_ref, w_ref, o_ref):
    # x_ref: (tb, K) batch tile of concatenated inputs [x0 | x1 | x2]
    # w_ref: (K, N)  pre-transposed concatenated weights [Wa | Wb | Wc].T
    # Single MXU matmul; the identity final layer is a no-op and is elided.
    o_ref[...] = jnp.dot(
        x_ref[...], w_ref[...], preferred_element_type=jnp.float32
    ).astype(o_ref.dtype)


def adder_forward(x0, x1, x2, w_a, w_b, w_c, *, batch_tile=256):
    """Forward pass of Adder: A(x0) + B(x1) + C(x2).

    Weights are PyTorch-layout (out_features, in_features).  They are fused and
    transposed once here (static, outside the kernel hot path).
    """
    # Fuse the three operator matmuls into one.
    x_cat = jnp.concatenate([x0, x1, x2], axis=1)                # (B, K)
    w_cat_t = jnp.concatenate([w_a, w_b, w_c], axis=1).T         # (K, N)
    w_cat_t = jnp.asarray(w_cat_t, dtype=jnp.float32)

    batch, k_dim = x_cat.shape
    n_dim = w_a.shape[0]  # meta_space_dim

    # Batch tile: multiple of 8 sublanes when possible, capped by batch_tile.
    tb = min(batch_tile, batch)
    grid = (pl.cdiv(batch, tb),)

    return pl.pallas_call(
        adder_kernel,
        out_shape=jax.ShapeDtypeStruct((batch, n_dim), jnp.float32),
        grid=grid,
        in_specs=[
            # Batch-tiled activations.
            pl.BlockSpec((tb, k_dim), lambda i: (i, 0)),
            # Weights resident in VMEM across all grid steps.
            pl.BlockSpec((k_dim, n_dim), lambda i: (0, 0)),
        ],
        out_specs=pl.BlockSpec((tb, n_dim), lambda i: (i, 0)),
        compiler_params=pltpu.CompilerParams(
            dimension_semantics=("parallel",),
        ),
    )(x_cat, w_cat_t)


if __name__ == "__main__":
    key = jax.random.PRNGKey(0)

    batch = 8
    meta_dim = 32   # lifted-state dimension (operators[0].operator[0].out_features)
    d1 = 16         # state-space vector dim
    d2 = 8          # control input dim

    k0, k1, k2, ka, kb, kc = jax.random.split(key, 6)

    # inputs: x0 (lifted state) must have shape[1] == meta_dim
    x0 = jax.random.normal(k0, (batch, meta_dim), dtype=jnp.float32)
    x1 = jax.random.normal(k1, (batch, d1), dtype=jnp.float32)
    x2 = jax.random.normal(k2, (batch, d2), dtype=jnp.float32)

    # "operator" weights, PyTorch (out_features, in_features) layout
    w_a = jax.random.normal(ka, (meta_dim, meta_dim), dtype=jnp.float32) * 0.1
    w_b = jax.random.normal(kb, (meta_dim, d1), dtype=jnp.float32) * 0.1
    w_c = jax.random.normal(kc, (meta_dim, d2), dtype=jnp.float32) * 0.1

    out = adder_forward(x0, x1, x2, w_a, w_b, w_c)
    out = jax.block_until_ready(out)

    # Reference: identity-concat final layer == sum of operator outputs.
    ref = (x0 @ w_a.T) + (x1 @ w_b.T) + (x2 @ w_c.T)
    assert out.shape == (batch, meta_dim)
    assert jnp.allclose(out, ref, atol=1e-5, rtol=1e-5)

    print("KERNEL_OK")
</pallas_src>

<mosaic_0001>
module attributes {stable_mosaic.version = 11 : i64} {
  func.func @adder_kernel(%arg0: i32, %arg1: memref<8x56xf32, #tpu.memory_space<vmem>>, %arg2: memref<56x32xf32, #tpu.memory_space<vmem>>, %arg3: memref<8x32xf32, #tpu.memory_space<vmem>>) attributes {dimension_semantics = [#tpu.dimension_semantics<parallel>], iteration_bounds = array<i64: 1>, scalar_prefetch = 0 : i64, scratch_operands = 0 : i64, tpu.core_type = #tpu.core_type<tc>, window_params = [{transform_indices = @transform_0, window_bounds = array<i64: 8, 56>}, {pipeline_mode = #tpu.pipeline_mode<synchronous>, transform_indices = @transform_1, window_bounds = array<i64: 56, 32>}, {transform_indices = @transform_2, window_bounds = array<i64: 8, 32>}]} {
    %c0 = arith.constant 0 : index
    %c0_0 = arith.constant 0 : index
    %0 = vector.load %arg1[%c0, %c0_0] : memref<8x56xf32, #tpu.memory_space<vmem>>, vector<8x56xf32>
    %c0_1 = arith.constant 0 : index
    %c0_2 = arith.constant 0 : index
    %1 = vector.load %arg2[%c0_1, %c0_2] : memref<56x32xf32, #tpu.memory_space<vmem>>, vector<56x32xf32>
    %cst = arith.constant dense<0.000000e+00> : vector<8x32xf32>
    %2 = tpu.matmul %0, %1, %cst {dimension_numbers = #tpu.dot_dimension_numbers<[1], [0], [0], [1], [0, 0, 1, 1], [], []>} : vector<8x56xf32>, vector<56x32xf32>, vector<8x32xf32> -> vector<8x32xf32>
    %c0_3 = arith.constant 0 : index
    %c0_4 = arith.constant 0 : index
    %3 = vector.load %arg3[%c0_3, %c0_4] : memref<8x32xf32, #tpu.memory_space<vmem>>, vector<8x32xf32>
    tpu.vector_store %arg3[%c0_3, %c0_4], %2 {strides = array<i32>} : memref<8x32xf32, #tpu.memory_space<vmem>>, vector<8x32xf32>,
    return
  }
  func.func @transform_0(%arg0: i32) -> (i32, i32) {
    %c0_i32 = arith.constant 0 : i32
    %c0_i32_0 = arith.constant 0 : i32
    return %arg0, %c0_i32 : i32, i32
  }
  func.func @transform_1(%arg0: i32) -> (i32, i32) {
    %c0_i32 = arith.constant 0 : i32
    %c0_i32_0 = arith.constant 0 : i32
    %c0_i32_1 = arith.constant 0 : i32
    return %c0_i32, %c0_i32_0 : i32, i32
  }
  func.func @transform_2(%arg0: i32) -> (i32, i32) {
    %c0_i32 = arith.constant 0 : i32
    %c0_i32_0 = arith.constant 0 : i32
    return %arg0, %c0_i32 : i32, i32
  }
}

</mosaic_0001>

<bundles_post_ra>
// kernel: tpu_custom_call.1
= control target key start
LH: loop header
LB: loop body
LE: loop exit
PB: predicated region body
PF: predicated region fallthrough
CT: control target
= control target key end

     0   :  { %s133_s0 = inlined_call_operand.vmem [shape: f32[8,56], index: 0, kind: input, shape index: {}]   ;;  %s134_s1 = inlined_call_operand.vmem [shape: f32[56,32], index: 1, kind: input, shape index: {}]   ;;  %s135_s2 = inlined_call_operand.hbm [shape: f32[8,32], index: 2, kind: output, shape index: {}]  }
   0x1   :  { %v19_v0 = vld [vmem:[%s134_s1 + $0x30] sm:$0xff]  ;;  %v18_v1 = vld [vmem:[%s134_s1 + $0x28] sm:$0xff]  ;;  %v17_v2 = vld [vmem:[%s134_s1 + $0x20] sm:$0xff] }
   0x2   :  { %33 = vmatpush.msra.mxu0 %v19_v0 }
   0x3   :  { %7 = vsyncpa [#allocation3], 0  ;;  %v16_v3 = vld [vmem:[%s134_s1 + $0x18] sm:$0xff]  ;;  %v15_v4 = vld [vmem:[%s134_s1 + $0x10] sm:$0xff]  ;;  %vm20_vm0 = vcmask 457728   ;;  %s90_s25 = smov [#allocation2]  }
   0x4   :  { %34 = vmatpush.msra.mxu0 %v18_v1  ;;  %v14_v5 = vld [vmem:[%s134_s1 + $0x8] sm:$0xff]  ;;  %v13_v6 = vld [vmem:[%s134_s1] sm:$0xff]  ;;  %s51_s26 = sshll.u32 %s90_s25, 4  ;;  %s53_s29 = sshll.u32 %s135_s2, 4  ;;  %vm44_vm1 = vcmask 261120   ;;  %s52_s26 = int_to_ptr.vmem [resolvable:$true] %s51_s26  ;;  %s54_s29 = int_to_ptr.hbm [resolvable:$true] %s53_s29 }
   0x5   :  { %v12_v7 = vld [vmem:[%s133_s0] sm:$0xff] }
   0x6   :  { %35 = vmatpush.msra.mxu0 %v17_v2 }
   0x8   :  { %36 = vmatpush.msra.mxu0 %v16_v3 }
   0xa   :  { %37 = vmatpush.msra.mxu0 %v15_v4 }
   0xc   :  { %38 = vmatpush.msra.mxu0 %v14_v5 }
   0xe   :  { %39 = vmatpush.msra.mxu0 %v13_v6 }
   0xf   :  { %62 = vmatmul.msk.f32.vlgmr.msra.gmra.mxu0 %vm20_vm0, %v12_v7 }
  0x8c   :  { %v41_v8 = vpop.f32.mrf.mxu0 }
  0x8d   :  { %45 = vst.msk [vmem:[#allocation2] sm:$0xff] %vm44_vm1, %v41_v8 }
  0x8e   :  { %56 = dma.vmem_to_hbm [thread:$0]  %s52_s26, 128, %s54_s29, [#allocation3]  }
  0x8f   :  { %88 = dma.done.wait [#allocation3], 128  }
  0x90   :  { %89 = vsyncadd [#allocation3], 4294967168 }
  0x91   :  { %61 = vsyncpa [#allocation3], 1 }

</bundles_post_ra>
